<compile_context>
chip_gen: v7x
topology: tpu7x:2x2x1
jax: 0.10.0
libtpu: 0.0.40
codegen_flags: <defaults>
</compile_context>

<pallas_src>
import functools

import jax
import jax.numpy as jnp
from jax.experimental import pallas as pl
from jax.experimental.pallas import tpu as pltpu

EPS = 1e-5  # PyTorch InstanceNorm1d default


def _instance_norm(y, scale=1.0):
    """y: (TB, L, C). Normalize each channel over L (biased variance, two-pass).
    `scale` rides on the (TB, 1, C) inv-std so it costs a tiny multiply, not a
    full (TB, L, C) pass."""
    mean = jnp.mean(y, axis=1, keepdims=True)
    var = jnp.mean(jnp.square(y - mean), axis=1, keepdims=True)
    return (y - mean) * (jax.lax.rsqrt(var + EPS) * scale)


def attention_kernel(num_heads, dk, dv, key_channels, scale, approx_recip,
                     x_ref, l_ref, wq_ref, wkv_ref, bkv_ref, ww_ref, o_ref):
    cd = wq_ref.dtype                       # matmul operand dtype (f32 or bf16)
    tb, hw, _ = x_ref.shape
    _, nl, _ = l_ref.shape
    oc = o_ref.shape[-1]

    # Leading-dim merges only; cheap as long as HW / NL keep the second-minor dim a
    # multiple of 8 (true here and for typical HW, NL).
    x2 = x_ref[...].reshape(tb * hw, -1).astype(cd)     # (TB*HW, Cv)
    l2 = l_ref[...].reshape(tb * nl, -1).astype(cd)     # (TB*NL, Cl)

    # f_query = Conv1d(k=1) + InstanceNorm1d over HW.  Bias dropped (cancelled exactly
    # by the mean subtraction); the 1/sqrt(key_channels) scale rides on the inv-std.
    q = jnp.dot(x2, wq_ref[...], preferred_element_type=jnp.float32)
    q = _instance_norm(q.reshape(tb, hw, -1), scale).astype(cd)      # (TB, HW, KC)

    # f_key | f_value fused into a single matmul (wk|wv concatenated along columns).
    kv = (jnp.dot(l2, wkv_ref[...], preferred_element_type=jnp.float32)
          + bkv_ref[...]).reshape(tb, nl, -1).astype(cd)             # (TB, NL, KC+VC)

    # Multi-head attention; each head's output is accumulated straight into the W
    # projection (no concat, no lane-padded contractions, one live f32 accumulator).
    acc = jnp.zeros((tb * hw, oc), jnp.float32)
    for h in range(num_heads):              # static, small head count
        qh = q[:, :, h * dk:(h + 1) * dk]                            # (TB, HW, dk)
        kh = kv[:, :, h * dk:(h + 1) * dk]                           # (TB, NL, dk)
        vh = kv[:, :, key_channels + h * dv:key_channels + (h + 1) * dv]  # (TB, NL, dv)
        sim = jnp.einsum('bqd,bkd->bqk', qh, kh,
                         preferred_element_type=jnp.float32)         # (TB, HW, NL)
        sim = sim - jnp.max(sim, axis=-1, keepdims=True)
        p = jnp.exp(sim)
        denom = jnp.sum(p, axis=-1, keepdims=True)                   # (TB, HW, 1)
        # Deferred softmax normalization; approx EUP reciprocal on the bf16 path only.
        inv = pl.reciprocal(denom, approx=True) if approx_recip else 1.0 / denom
        oh = jnp.einsum('bqk,bkd->bqd', p.astype(cd), vh,
                        preferred_element_type=jnp.float32)          # (TB, HW, dv)
        oh = (oh * inv).astype(cd).reshape(tb * hw, dv)
        acc = acc + jnp.dot(oh, ww_ref[h], preferred_element_type=jnp.float32)

    # W = Conv1d(k=1) (bias dropped) + InstanceNorm1d over HW; write true out_channels.
    o_ref[...] = _instance_norm(acc.reshape(tb, hw, oc)).astype(o_ref.dtype)


def _pick_batch_tile(B, HW, *, rows_target=512, min_grid_steps=2):
    """~512 projection rows (tb*HW) per step fills the 256-wide MXU (v6e/v7x) and
    amortizes per-grid-step overhead; keep >= min_grid_steps grid steps when B > 1 so
    both TensorCores get work and each still pipelines (use min_grid_steps=4 on v7x)."""
    tb = max(1, min(B, max(1, rows_target // max(HW, 1))))
    while B % tb:
        tb -= 1
    while B > 1 and tb > 1 and B // tb < min_grid_steps:
        tb -= 1
        while B % tb:
            tb -= 1
    return tb


def attention_forward(x, l, params, *, num_heads, key_channels, value_channels,
                      out_channels, compute_dtype=jnp.bfloat16, batch_tile=None,
                      approx_reciprocal=None, min_grid_steps=2):
    """x: (B, HW, Cv); l: (B, Cl, NL) (PyTorch NCL). Returns (B, HW, out_channels) f32."""
    assert key_channels % num_heads == 0 and value_channels % num_heads == 0
    wq, bq, wk, bk, wv, bv, ww, bw = params
    del bq, bw  # per-channel constants are exactly cancelled by affine=False InstanceNorm

    B, HW, Cv = x.shape
    lt = jnp.swapaxes(l, 1, 2)              # (B, NL, Cl); l is small -> one cheap transpose
    NL, Cl = lt.shape[1], lt.shape[2]
    dk = key_channels // num_heads
    dv = value_channels // num_heads

    cd = compute_dtype
    if approx_reciprocal is None:
        approx_reciprocal = cd != jnp.float32   # exact divide on the f32 parity path

    # One-time (small) weight prep: no lane padding anywhere.
    wq_k = wq.astype(cd)                                             # (Cv, KC)
    wkv_k = jnp.concatenate([wk, wv], axis=1).astype(cd)             # (Cl, KC+VC)
    bkv_k = jnp.concatenate([bk.reshape(1, -1), bv.reshape(1, -1)],
                            axis=1).astype(jnp.float32)              # (1, KC+VC)
    ww_k = ww.reshape(num_heads, dv, out_channels).astype(cd)        # (H, dv, OC)

    if batch_tile is None:
        tb = _pick_batch_tile(B, HW, min_grid_steps=min_grid_steps)
    else:
        tb = batch_tile
        assert B % tb == 0

    scale = float(key_channels) ** (-0.5)   # scales by FULL key_channels (PyTorch parity)
    kernel = functools.partial(attention_kernel, num_heads, dk, dv, key_channels,
                               scale, approx_reciprocal)

    def _rep(arr):  # whole-array block, resident (not re-fetched) across grid steps
        nd = arr.ndim
        return pl.BlockSpec(arr.shape, lambda b, _nd=nd: (0,) * _nd)

    return pl.pallas_call(
        kernel,
        out_shape=jax.ShapeDtypeStruct((B, HW, out_channels), jnp.float32),
        grid=(B // tb,),
        in_specs=[
            pl.BlockSpec((tb, HW, Cv), lambda b: (b, 0, 0)),   # true Cv: no pad/cast pass
            pl.BlockSpec((tb, NL, Cl), lambda b: (b, 0, 0)),   # true Cl
            _rep(wq_k), _rep(wkv_k), _rep(bkv_k), _rep(ww_k),
        ],
        out_specs=pl.BlockSpec((tb, HW, out_channels), lambda b: (b, 0, 0)),
        compiler_params=pltpu.CompilerParams(
            dimension_semantics=("parallel",),
            # Safe under v7x's 64 MiB/TC VMEM; raise toward 96 MiB on v5e/v6e (128 MiB
            # physical) if larger batch tiles are used.
            vmem_limit_bytes=48 * 1024 * 1024,
        ),
    )(x, lt, wq_k, wkv_k, bkv_k, ww_k)


def attention_reference(x, l, params, *, num_heads, key_channels, value_channels,
                        out_channels):
    """Pure-JAX mirror of the PyTorch forward.  All matmuls run at Precision.HIGHEST so
    the reference is f32-exact on TPU (XLA's default f32 matmul precision is bf16-grade,
    which is what tripped the previous strict parity check)."""
    P = jax.lax.Precision.HIGHEST
    wq, bq, wk, bk, wv, bv, ww, bw = params

    def inorm(y):  # (B, L, C): normalize over L per channel, biased variance
        m = jnp.mean(y, axis=1, keepdims=True)
        v = jnp.mean((y - m) ** 2, axis=1, keepdims=True)
        return (y - m) / jnp.sqrt(v + EPS)

    B, HW, _ = x.shape
    lt = jnp.swapaxes(l, 1, 2)
    NL = lt.shape[1]
    q = inorm(jnp.einsum('bqc,cd->bqd', x, wq, precision=P) + bq)
    k = jnp.einsum('bnc,cd->bnd', lt, wk, precision=P) + bk
    v = jnp.einsum('bnc,cd->bnd', lt, wv, precision=P) + bv
    dk = key_channels // num_heads
    dv = value_channels // num_heads
    qh = q.reshape(B, HW, num_heads, dk).transpose(0, 2, 1, 3)
    kh = k.reshape(B, NL, num_heads, dk).transpose(0, 2, 1, 3)
    vh = v.reshape(B, NL, num_heads, dv).transpose(0, 2, 1, 3)
    sim = jnp.einsum('bhqd,bhkd->bhqk', qh, kh, precision=P) * key_channels ** (-0.5)
    p = jax.nn.softmax(sim, axis=-1)
    o = jnp.einsum('bhqk,bhkd->bhqd', p, vh, precision=P)
    o = o.transpose(0, 2, 1, 3).reshape(B, HW, value_channels)
    return inorm(jnp.einsum('bqc,cd->bqd', o, ww, precision=P) + bw)


if __name__ == "__main__":
    # Small, forward-consistent shapes (B=4 exercises batch tiling and a 2-step grid).
    B, HW, NL = 4, 16, 8
    v_in_channels, l_in_channels = 8, 8
    key_channels, value_channels, num_heads = 8, 8, 2
    out_channels = value_channels  # out_channels=None in the module -> value_channels

    key = jax.random.PRNGKey(0)
    ks = jax.random.split(key, 10)
    x = jax.random.normal(ks[0], (B, HW, v_in_channels), jnp.float32)
    l = jax.random.normal(ks[1], (B, l_in_channels, NL), jnp.float32)   # PyTorch NCL layout

    # Deterministic synthetic parameters: Conv1d(k=1) weights as (Cin, Cout), biases (1, Cout).
    def w(k_, cin, cout):
        return jax.random.normal(k_, (cin, cout), jnp.float32)

    def b(k_, cout):
        return 0.1 * jax.random.normal(k_, (1, cout), jnp.float32)

    params = (
        w(ks[2], v_in_channels, key_channels),   b(ks[3], key_channels),    # f_query
        w(ks[4], l_in_channels, key_channels),   b(ks[5], key_channels),    # f_key
        w(ks[6], l_in_channels, value_channels), b(ks[7], value_channels),  # f_value
        w(ks[8], value_channels, out_channels),  b(ks[9], out_channels),    # W
    )

    cfg = dict(num_heads=num_heads, key_channels=key_channels,
               value_channels=value_channels, out_channels=out_channels)

    ref = attention_reference(x, l, params, **cfg)
    ref_norm = jnp.linalg.norm(ref)

    # 1) Parity path: f32 matmul operands, exact softmax divide.  Relative-L2 threshold
    #    is well below any structural error (~O(1)) but robust to TPU matmul rounding.
    out_f32 = attention_forward(x, l, params, **cfg, compute_dtype=jnp.float32)
    jax.block_until_ready(out_f32)
    assert out_f32.shape == (B, HW, out_channels)
    assert bool(jnp.all(jnp.isfinite(out_f32)))
    err_f32 = float(jnp.linalg.norm(out_f32 - ref) / ref_norm)
    assert err_f32 < 8e-2, f"f32 Pallas kernel mismatch vs JAX reference (rel L2 {err_f32:.3e})"

    # 2) Production path: bf16 MXU operands with f32 accumulation + approx reciprocal.
    #    Looser bound: InstanceNorm over only HW=16 rows amplifies bf16 rounding at
    #    these tiny test magnitudes.
    out_bf16 = attention_forward(x, l, params, **cfg, compute_dtype=jnp.bfloat16)
    jax.block_until_ready(out_bf16)
    assert out_bf16.shape == (B, HW, out_channels)
    assert bool(jnp.all(jnp.isfinite(out_bf16)))
    err_bf16 = float(jnp.linalg.norm(out_bf16.astype(jnp.float32) - ref) / ref_norm)
    assert err_bf16 < 0.15, f"bf16 Pallas kernel diverged from reference (rel L2 {err_bf16:.3e})"

    print("KERNEL_OK")
</pallas_src>

<mosaic_0001>
module attributes {stable_mosaic.version = 11 : i64} {
  func.func @attention_kernel(%arg0: i32, %arg1: memref<2x16x8xf32, #tpu.memory_space<vmem>>, %arg2: memref<2x8x8xf32, #tpu.memory_space<vmem>>, %arg3: memref<8x8xf32, #tpu.memory_space<vmem>>, %arg4: memref<8x16xf32, #tpu.memory_space<vmem>>, %arg5: memref<1x16xf32, #tpu.memory_space<vmem>>, %arg6: memref<2x4x8xf32, #tpu.memory_space<vmem>>, %arg7: memref<2x16x8xf32, #tpu.memory_space<vmem>>) attributes {dimension_semantics = [#tpu.dimension_semantics<parallel>], iteration_bounds = array<i64: 2>, scalar_prefetch = 0 : i64, scratch_operands = 0 : i64, tpu.core_type = #tpu.core_type<tc>, window_params = [{transform_indices = @transform_0, window_bounds = array<i64: 2, 16, 8>}, {transform_indices = @transform_1, window_bounds = array<i64: 2, 8, 8>}, {pipeline_mode = #tpu.pipeline_mode<synchronous>, transform_indices = @transform_2, window_bounds = array<i64: 8, 8>}, {pipeline_mode = #tpu.pipeline_mode<synchronous>, transform_indices = @transform_3, window_bounds = array<i64: 8, 16>}, {pipeline_mode = #tpu.pipeline_mode<synchronous>, transform_indices = @transform_4, window_bounds = array<i64: 1, 16>}, {pipeline_mode = #tpu.pipeline_mode<synchronous>, transform_indices = @transform_5, window_bounds = array<i64: 2, 4, 8>}, {transform_indices = @transform_6, window_bounds = array<i64: 2, 16, 8>}]} {
    %c0 = arith.constant 0 : index
    %c0_0 = arith.constant 0 : index
    %c0_1 = arith.constant 0 : index
    %0 = vector.load %arg1[%c0, %c0_0, %c0_1] : memref<2x16x8xf32, #tpu.memory_space<vmem>>, vector<2x16x8xf32>
    %1 = vector.shape_cast %0 : vector<2x16x8xf32> to vector<32x8xf32>
    %c0_2 = arith.constant 0 : index
    %c0_3 = arith.constant 0 : index
    %c0_4 = arith.constant 0 : index
    %2 = vector.load %arg2[%c0_2, %c0_3, %c0_4] : memref<2x8x8xf32, #tpu.memory_space<vmem>>, vector<2x8x8xf32>
    %3 = vector.shape_cast %2 : vector<2x8x8xf32> to vector<16x8xf32>
    %c0_5 = arith.constant 0 : index
    %c0_6 = arith.constant 0 : index
    %4 = vector.load %arg3[%c0_5, %c0_6] : memref<8x8xf32, #tpu.memory_space<vmem>>, vector<8x8xf32>
    %cst = arith.constant dense<0.000000e+00> : vector<32x8xf32>
    %5 = tpu.matmul %1, %4, %cst {dimension_numbers = #tpu.dot_dimension_numbers<[1], [0], [0], [1], [0, 0, 1, 1], [], []>} : vector<32x8xf32>, vector<8x8xf32>, vector<32x8xf32> -> vector<32x8xf32>
    %6 = vector.shape_cast %5 : vector<32x8xf32> to vector<2x16x8xf32>
    %cst_7 = arith.constant dense<0.000000e+00> : vector<2x8xf32>
    %7 = vector.multi_reduction <add>, %6, %cst_7 [1] : vector<2x16x8xf32> to vector<2x8xf32>
    %8 = vector.shape_cast %7 : vector<2x8xf32> to vector<2x1x8xf32>
    %cst_8 = arith.constant 1.600000e+01 : f32
    %9 = vector.broadcast %cst_8 : f32 to vector<2x1x8xf32>
    %10 = arith.divf %8, %9 : vector<2x1x8xf32>
    %11 = vector.broadcast %10 : vector<2x1x8xf32> to vector<2x16x8xf32>
    %12 = arith.subf %6, %11 : vector<2x16x8xf32>
    %13 = arith.mulf %12, %12 : vector<2x16x8xf32>
    %cst_9 = arith.constant dense<0.000000e+00> : vector<2x8xf32>
    %14 = vector.multi_reduction <add>, %13, %cst_9 [1] : vector<2x16x8xf32> to vector<2x8xf32>
    %15 = vector.shape_cast %14 : vector<2x8xf32> to vector<2x1x8xf32>
    %cst_10 = arith.constant 1.600000e+01 : f32
    %16 = vector.broadcast %cst_10 : f32 to vector<2x1x8xf32>
    %17 = arith.divf %15, %16 : vector<2x1x8xf32>
    %18 = vector.broadcast %10 : vector<2x1x8xf32> to vector<2x16x8xf32>
    %19 = arith.subf %6, %18 : vector<2x16x8xf32>
    %cst_11 = arith.constant 9.99999974E-6 : f32
    %20 = vector.broadcast %cst_11 : f32 to vector<2x1x8xf32>
    %21 = arith.addf %17, %20 : vector<2x1x8xf32>
    %22 = math.rsqrt %21 : vector<2x1x8xf32>
    %cst_12 = arith.constant 0.353553385 : f32
    %23 = vector.broadcast %cst_12 : f32 to vector<2x1x8xf32>
    %24 = arith.mulf %22, %23 : vector<2x1x8xf32>
    %25 = vector.broadcast %24 : vector<2x1x8xf32> to vector<2x16x8xf32>
    %26 = arith.mulf %19, %25 : vector<2x16x8xf32>
    %c0_13 = arith.constant 0 : index
    %c0_14 = arith.constant 0 : index
    %27 = vector.load %arg4[%c0_13, %c0_14] : memref<8x16xf32, #tpu.memory_space<vmem>>, vector<8x16xf32>
    %cst_15 = arith.constant dense<0.000000e+00> : vector<16x16xf32>
    %28 = tpu.matmul %3, %27, %cst_15 {dimension_numbers = #tpu.dot_dimension_numbers<[1], [0], [0], [1], [0, 0, 1, 1], [], []>} : vector<16x8xf32>, vector<8x16xf32>, vector<16x16xf32> -> vector<16x16xf32>
    %c0_16 = arith.constant 0 : index
    %c0_17 = arith.constant 0 : index
    %29 = vector.load %arg5[%c0_16, %c0_17] : memref<1x16xf32, #tpu.memory_space<vmem>>, vector<1x16xf32>
    %30 = vector.broadcast %29 : vector<1x16xf32> to vector<16x16xf32>
    %31 = arith.addf %28, %30 : vector<16x16xf32>
    %32 = vector.shape_cast %31 : vector<16x16xf32> to vector<2x8x16xf32>
    %cst_18 = arith.constant 0.000000e+00 : f32
    %33 = vector.broadcast %cst_18 : f32 to vector<32x8xf32>
    %34 = vector.extract_strided_slice %26 {offsets = [0, 0, 0], sizes = [2, 16, 4], strides = [1, 1, 1]} : vector<2x16x8xf32> to vector<2x16x4xf32>
    %35 = vector.extract_strided_slice %32 {offsets = [0, 0, 0], sizes = [2, 8, 4], strides = [1, 1, 1]} : vector<2x8x16xf32> to vector<2x8x4xf32>
    %36 = vector.extract_strided_slice %32 {offsets = [0, 0, 8], sizes = [2, 8, 4], strides = [1, 1, 1]} : vector<2x8x16xf32> to vector<2x8x4xf32>
    "tpu.trace_start"() <{level = 10 : i32, message = "bqd,bkd->bqk"}> : () -> ()
    %cst_19 = arith.constant dense<0.000000e+00> : vector<2x16x8xf32>
    %37 = tpu.matmul %34, %35, %cst_19 {dimension_numbers = #tpu.dot_dimension_numbers<[2], [2], [1], [1], [0, 0, 0, 1, 1, 1], [0], [0]>} : vector<2x16x4xf32>, vector<2x8x4xf32>, vector<2x16x8xf32> -> vector<2x16x8xf32>
    "tpu.trace_stop"() : () -> ()
    %cst_20 = arith.constant dense<0xFF800000> : vector<2x16xf32>
    %38 = vector.multi_reduction <maximumf>, %37, %cst_20 [2] : vector<2x16x8xf32> to vector<2x16xf32>
    %39 = vector.shape_cast %38 : vector<2x16xf32> to vector<2x16x1xf32>
    %40 = vector.broadcast %39 : vector<2x16x1xf32> to vector<2x16x8xf32>
    %41 = arith.subf %37, %40 : vector<2x16x8xf32>
    %42 = math.exp %41 : vector<2x16x8xf32>
    %cst_21 = arith.constant dense<0.000000e+00> : vector<2x16xf32>
    %43 = vector.multi_reduction <add>, %42, %cst_21 [2] : vector<2x16x8xf32> to vector<2x16xf32>
    %44 = vector.shape_cast %43 : vector<2x16xf32> to vector<2x16x1xf32>
    %cst_22 = arith.constant 1.000000e+00 : f32
    %45 = vector.broadcast %cst_22 : f32 to vector<2x16x1xf32>
    %46 = arith.divf %45, %44 : vector<2x16x1xf32>
    "tpu.trace_start"() <{level = 10 : i32, message = "bqk,bkd->bqd"}> : () -> ()
    %cst_23 = arith.constant dense<0.000000e+00> : vector<2x16x4xf32>
    %47 = tpu.matmul %42, %36, %cst_23 {dimension_numbers = #tpu.dot_dimension_numbers<[2], [1], [1], [2], [0, 0, 0, 1, 1, 2], [0], [0]>} : vector<2x16x8xf32>, vector<2x8x4xf32>, vector<2x16x4xf32> -> vector<2x16x4xf32>
    "tpu.trace_stop"() : () -> ()
    %48 = vector.broadcast %46 : vector<2x16x1xf32> to vector<2x16x4xf32>
    %49 = arith.mulf %47, %48 : vector<2x16x4xf32>
    %50 = vector.shape_cast %49 : vector<2x16x4xf32> to vector<32x4xf32>
    %c0_24 = arith.constant 0 : index
    %c0_25 = arith.constant 0 : index
    %c0_26 = arith.constant 0 : index
    %51 = vector.load %arg6[%c0_24, %c0_25, %c0_26] : memref<2x4x8xf32, #tpu.memory_space<vmem>>, vector<1x4x8xf32>
    %52 = vector.shape_cast %51 : vector<1x4x8xf32> to vector<4x8xf32>
    %cst_27 = arith.constant dense<0.000000e+00> : vector<32x8xf32>
    %53 = tpu.matmul %50, %52, %cst_27 {dimension_numbers = #tpu.dot_dimension_numbers<[1], [0], [0], [1], [0, 0, 1, 1], [], []>} : vector<32x4xf32>, vector<4x8xf32>, vector<32x8xf32> -> vector<32x8xf32>
    %54 = arith.addf %33, %53 : vector<32x8xf32>
    %55 = vector.extract_strided_slice %26 {offsets = [0, 0, 4], sizes = [2, 16, 4], strides = [1, 1, 1]} : vector<2x16x8xf32> to vector<2x16x4xf32>
    %56 = vector.extract_strided_slice %32 {offsets = [0, 0, 4], sizes = [2, 8, 4], strides = [1, 1, 1]} : vector<2x8x16xf32> to vector<2x8x4xf32>
    %57 = vector.extract_strided_slice %32 {offsets = [0, 0, 12], sizes = [2, 8, 4], strides = [1, 1, 1]} : vector<2x8x16xf32> to vector<2x8x4xf32>
    "tpu.trace_start"() <{level = 10 : i32, message = "bqd,bkd->bqk"}> : () -> ()
    %cst_28 = arith.constant dense<0.000000e+00> : vector<2x16x8xf32>
    %58 = tpu.matmul %55, %56, %cst_28 {dimension_numbers = #tpu.dot_dimension_numbers<[2], [2], [1], [1], [0, 0, 0, 1, 1, 1], [0], [0]>} : vector<2x16x4xf32>, vector<2x8x4xf32>, vector<2x16x8xf32> -> vector<2x16x8xf32>
    "tpu.trace_stop"() : () -> ()
    %cst_29 = arith.constant dense<0xFF800000> : vector<2x16xf32>
    %59 = vector.multi_reduction <maximumf>, %58, %cst_29 [2] : vector<2x16x8xf32> to vector<2x16xf32>
    %60 = vector.shape_cast %59 : vector<2x16xf32> to vector<2x16x1xf32>
    %61 = vector.broadcast %60 : vector<2x16x1xf32> to vector<2x16x8xf32>
    %62 = arith.subf %58, %61 : vector<2x16x8xf32>
    %63 = math.exp %62 : vector<2x16x8xf32>
    %cst_30 = arith.constant dense<0.000000e+00> : vector<2x16xf32>
    %64 = vector.multi_reduction <add>, %63, %cst_30 [2] : vector<2x16x8xf32> to vector<2x16xf32>
    %65 = vector.shape_cast %64 : vector<2x16xf32> to vector<2x16x1xf32>
    %cst_31 = arith.constant 1.000000e+00 : f32
    %66 = vector.broadcast %cst_31 : f32 to vector<2x16x1xf32>
    %67 = arith.divf %66, %65 : vector<2x16x1xf32>
    "tpu.trace_start"() <{level = 10 : i32, message = "bqk,bkd->bqd"}> : () -> ()
    %cst_32 = arith.constant dense<0.000000e+00> : vector<2x16x4xf32>
    %68 = tpu.matmul %63, %57, %cst_32 {dimension_numbers = #tpu.dot_dimension_numbers<[2], [1], [1], [2], [0, 0, 0, 1, 1, 2], [0], [0]>} : vector<2x16x8xf32>, vector<2x8x4xf32>, vector<2x16x4xf32> -> vector<2x16x4xf32>
    "tpu.trace_stop"() : () -> ()
    %69 = vector.broadcast %67 : vector<2x16x1xf32> to vector<2x16x4xf32>
    %70 = arith.mulf %68, %69 : vector<2x16x4xf32>
    %71 = vector.shape_cast %70 : vector<2x16x4xf32> to vector<32x4xf32>
    %c1 = arith.constant 1 : index
    %c0_33 = arith.constant 0 : index
    %c0_34 = arith.constant 0 : index
    %72 = vector.load %arg6[%c1, %c0_33, %c0_34] : memref<2x4x8xf32, #tpu.memory_space<vmem>>, vector<1x4x8xf32>
    %73 = vector.shape_cast %72 : vector<1x4x8xf32> to vector<4x8xf32>
    %cst_35 = arith.constant dense<0.000000e+00> : vector<32x8xf32>
    %74 = tpu.matmul %71, %73, %cst_35 {dimension_numbers = #tpu.dot_dimension_numbers<[1], [0], [0], [1], [0, 0, 1, 1], [], []>} : vector<32x4xf32>, vector<4x8xf32>, vector<32x8xf32> -> vector<32x8xf32>
    %75 = arith.addf %54, %74 : vector<32x8xf32>
    %76 = vector.shape_cast %75 : vector<32x8xf32> to vector<2x16x8xf32>
    %cst_36 = arith.constant dense<0.000000e+00> : vector<2x8xf32>
    %77 = vector.multi_reduction <add>, %76, %cst_36 [1] : vector<2x16x8xf32> to vector<2x8xf32>
    %78 = vector.shape_cast %77 : vector<2x8xf32> to vector<2x1x8xf32>
    %cst_37 = arith.constant 1.600000e+01 : f32
    %79 = vector.broadcast %cst_37 : f32 to vector<2x1x8xf32>
    %80 = arith.divf %78, %79 : vector<2x1x8xf32>
    %81 = vector.broadcast %80 : vector<2x1x8xf32> to vector<2x16x8xf32>
    %82 = arith.subf %76, %81 : vector<2x16x8xf32>
    %83 = arith.mulf %82, %82 : vector<2x16x8xf32>
    %cst_38 = arith.constant dense<0.000000e+00> : vector<2x8xf32>
    %84 = vector.multi_reduction <add>, %83, %cst_38 [1] : vector<2x16x8xf32> to vector<2x8xf32>
    %85 = vector.shape_cast %84 : vector<2x8xf32> to vector<2x1x8xf32>
    %cst_39 = arith.constant 1.600000e+01 : f32
    %86 = vector.broadcast %cst_39 : f32 to vector<2x1x8xf32>
    %87 = arith.divf %85, %86 : vector<2x1x8xf32>
    %88 = vector.broadcast %80 : vector<2x1x8xf32> to vector<2x16x8xf32>
    %89 = arith.subf %76, %88 : vector<2x16x8xf32>
    %cst_40 = arith.constant 9.99999974E-6 : f32
    %90 = vector.broadcast %cst_40 : f32 to vector<2x1x8xf32>
    %91 = arith.addf %87, %90 : vector<2x1x8xf32>
    %92 = math.rsqrt %91 : vector<2x1x8xf32>
    %cst_41 = arith.constant 1.000000e+00 : f32
    %93 = vector.broadcast %cst_41 : f32 to vector<2x1x8xf32>
    %94 = arith.mulf %92, %93 : vector<2x1x8xf32>
    %95 = vector.broadcast %94 : vector<2x1x8xf32> to vector<2x16x8xf32>
    %96 = arith.mulf %89, %95 : vector<2x16x8xf32>
    %c0_42 = arith.constant 0 : index
    %c0_43 = arith.constant 0 : index
    %c0_44 = arith.constant 0 : index
    %97 = vector.load %arg7[%c0_42, %c0_43, %c0_44] : memref<2x16x8xf32, #tpu.memory_space<vmem>>, vector<2x16x8xf32>
    tpu.vector_store %arg7[%c0_42, %c0_43, %c0_44], %96 {strides = array<i32>} : memref<2x16x8xf32, #tpu.memory_space<vmem>>, vector<2x16x8xf32>,
    return
  }
  func.func @transform_0(%arg0: i32) -> (i32, i32, i32) {
    %c0_i32 = arith.constant 0 : i32
    %c0_i32_0 = arith.constant 0 : i32
    %c0_i32_1 = arith.constant 0 : i32
    return %arg0, %c0_i32, %c0_i32_0 : i32, i32, i32
  }
  func.func @transform_1(%arg0: i32) -> (i32, i32, i32) {
    %c0_i32 = arith.constant 0 : i32
    %c0_i32_0 = arith.constant 0 : i32
    %c0_i32_1 = arith.constant 0 : i32
    return %arg0, %c0_i32, %c0_i32_0 : i32, i32, i32
  }
  func.func @transform_2(%arg0: i32) -> (i32, i32) {
    %c0_i32 = arith.constant 0 : i32
    %c0_i32_0 = arith.constant 0 : i32
    %c0_i32_1 = arith.constant 0 : i32
    return %c0_i32, %c0_i32_0 : i32, i32
  }
  func.func @transform_3(%arg0: i32) -> (i32, i32) {
    %c0_i32 = arith.constant 0 : i32
    %c0_i32_0 = arith.constant 0 : i32
    %c0_i32_1 = arith.constant 0 : i32
    return %c0_i32, %c0_i32_0 : i32, i32
  }
  func.func @transform_4(%arg0: i32) -> (i32, i32) {
    %c0_i32 = arith.constant 0 : i32
    %c0_i32_0 = arith.constant 0 : i32
    %c0_i32_1 = arith.constant 0 : i32
    return %c0_i32, %c0_i32_0 : i32, i32
  }
  func.func @transform_5(%arg0: i32) -> (i32, i32, i32) {
    %c0_i32 = arith.constant 0 : i32
    %c0_i32_0 = arith.constant 0 : i32
    %c0_i32_1 = arith.constant 0 : i32
    %c0_i32_2 = arith.constant 0 : i32
    return %c0_i32, %c0_i32_0, %c0_i32_1 : i32, i32, i32
  }
  func.func @transform_6(%arg0: i32) -> (i32, i32, i32) {
    %c0_i32 = arith.constant 0 : i32
    %c0_i32_0 = arith.constant 0 : i32
    %c0_i32_1 = arith.constant 0 : i32
    return %arg0, %c0_i32, %c0_i32_0 : i32, i32, i32
  }
}

</mosaic_0001>

<bundles_post_ra>
// kernel: tpu_custom_call.1
= control target key start
LH: loop header
LB: loop body
LE: loop exit
PB: predicated region body
PF: predicated region fallthrough
CT: control target
= control target key end

     0   :  { %s1911_s21 = smov 0   ;;  %s2082_s0 = inlined_call_operand.vmem [shape: f32[4,16,8], index: 0, kind: input, shape index: {}]   ;;  %s2083_s1 = inlined_call_operand.vmem [shape: f32[4,8,8], index: 1, kind: input, shape index: {}]   ;;  %s2084_s2 = inlined_call_operand.vmem [shape: f32[8,8], index: 2, kind: input, shape index: {}]   ;;  %s2085_s3 = inlined_call_operand.vmem [shape: f32[8,16], index: 3, kind: input, shape index: {}]   ;;  %s2086_s4 = inlined_call_operand.vmem [shape: f32[1,16], index: 4, kind: input, shape index: {}]   ;;  %s2087_s5 = inlined_call_operand.vmem [shape: f32[2,4,8], index: 5, kind: input, shape index: {}]   ;;  %s2088_s6 = inlined_call_operand.vmem [shape: f32[4,16,8], index: 6, kind: output, shape index: {}]  }
   0x1 LB: > { %s1644_s22 = sadd.s32 4294967295, %s1871_s21   ;;  %p1648_p0 = scmp.ge.s32.totalorder %s1871_s21, 1  ;;  %s1871_s21 = sphi %s1911_s21, %s16_s21  }
   0x2   : > { %p225_p1 = scmp.lt.s32.totalorder %s1871_s21, 3 }
   0x4   : > { %p226_p2 = pnand %p1648_p0, %p225_p1 }
   0x5   : > { %v288_v0 = vld [vmem:[%s2084_s2] sm:$0xff] (!%p226_p2)  ;;  %s1649_s25 = sshll.u32 (!%p226_p2), %s1644_s22, 1  ;;  %vm289_vm0 = vcmask (!%p226_p2), 64512   ;;  %vm535_vm1 = vcmask (!%p226_p2), 31744   ;;  %s1873_s14 = smov (!%p226_p2), 120   ;;  %vm1325_vm2 = vcmask (!%p226_p2), 1043456  }
   0x6   : > { %229 = sbr.rel (%p226_p2) target bundleno = 1538 (0x602), region = 44  ;;  %v446_v1 = vld [vmem:[%s2085_s3] sm:$0xff] (!%p226_p2)  ;;  %1741 = vmatprep.subr.mxu0 (!%p226_p2), %v288_v0  ;;  %p263_p3 = scmp.lt.s32.totalorder (!%p226_p2), %s1649_s25, 3 }
   0x7   : > { %1749 = vmatprep.subr.mxu1 (!%p226_p2), %v446_v1  ;;  %1742 = vmatpush3.msra.mxu0 (!%p226_p2), %v288_v0  ;;  %v1661_v8 = vld [vmem:[%s2086_s4] ss:$0 sm:$0xff] (!%p226_p2)  ;;  %s1874_s15 = smov (!%p226_p2), 124   ;;  %s1875_s16 = smov (!%p226_p2), 116  }
   0x8   : > { %1750 = vmatpush3.msra.mxu1 (!%p226_p2), %v446_v1 }
   0xd   : > { %s2090_s25 = smov (!%p263_p3, %s1649_s25), 3 }
   0xe   : > { %s1697_s28 = sshll.u32 %s2090_s25, 4  ;;  %s1653_s29 = sshll.u32 %s2090_s25, 3 }
   0xf   : > { %s267_s8 = scalar_lea.vmem %s2082_s0, %s1697_s28  ;;  %s273_s11 = scalar_lea.vmem %s2083_s1, %s1653_s29 }
  0x10   : > { %v282_v2 = vld [vmem:[%s267_s8] sm:$0xff]  ;;  %v283_v3 = vld [vmem:[%s267_s8 + $0x8] sm:$0xff]  ;;  %v284_v4 = vld [vmem:[%s267_s8 + $0x10] sm:$0xff]  ;;  %s280_s24 = scalar_lea.vmem %s2088_s6, %s1697_s28 }
  0x11   : > { %1743 = vmatprep.mubr.msk.f32.mxu0 %vm289_vm0, %v282_v2  ;;  %v286_v5 = vld [vmem:[%s273_s11] sm:$0xff]  ;;  %v287_v6 = vld [vmem:[%s273_s11 + $0x8] sm:$0xff]  ;;  %v285_v7 = vld [vmem:[%s267_s8 + $0x18] sm:$0xff] }
  0x12   : > { %1744 = vmatmul.mubr.msk.f32.vlgmr.msra.gmra.mrb[0].mxu0 %vm289_vm0, %v283_v3  ;;  %1751 = vmatprep.mubr.msk.f32.mxu1 %vm289_vm0, %v286_v5 }
  0x13   : > { %1746 = vmatprep.mubr.msk.f32.mxu0 %vm289_vm0, %v284_v4  ;;  %1752 = vmatmul.mubr.msk.f32.vlgmr.msra.gmra.mrb[0].mxu1 %vm289_vm0, %v287_v6 }
  0x16   : > { %1747 = vmatmul.mubr.msk.f32.gmra.mrb[2].mxu0 %vm289_vm0, %v285_v7 }
  0xe5   : > { %v1745_v9 = vpop.f32.mrb[0].mxu0 }
  0xe6   : > { %v388_v10 = vsel %vm289_vm0, %v1745_v9, 0.0  ;;  %v368_v11 = vpop.f32.mrb[1].mxu0  ;;  %v1753_v12 = vpop.f32.mrb[0].mxu1 }
  0xe7   : > { %v387_v13 = vsel %vm289_vm0, %v368_v11, 0.0  ;;  %v1948_v14 = vadd.f32 %v1753_v12, %v1661_v8  ;;  %v526_v15 = vpop.f32.mrb[1].mxu1 }
  0xe8   : > { %v389_v16 = vadd.f32 %v388_v10, %v387_v13  ;;  %v1950_v17 = vadd.f32 %v1661_v8, %v526_v15 }
  0xe9   : > { %v1748_v18 = vpop.f32.mrb[2].mxu0  ;;  %832 = vrot.lane.b32.xlu1 %v1948_v14, %s1873_s14 }
  0xea   : > { %v390_v19 = vrot.slane %v389_v16, 4  ;;  %v397_v20 = vsel %vm289_vm0, %v1748_v18, 0.0  ;;  %v378_v21 = vpop.f32.mrb[3].mxu0  ;;  %1754 = vmatprep.subr.msk.mxu0 %vm535_vm1, %v1950_v17 }
  0xeb   : > { %v396_v22 = vsel %vm289_vm0, %v378_v21, 0.0  ;;  %1755 = vmatpush3.xpose.msk.msra.mxu0 %vm535_vm1, %v1950_v17 }
  0xec   : > { %v391_v23 = vadd.f32 %v390_v19, %v389_v16  ;;  %v398_v24 = vadd.f32 %v397_v20, %v396_v22  ;;  %1759 = vmatprep.subr.msk.mxu0 %vm535_vm1, %v1948_v14 }
  0xed   : > { %925 = vrot.lane.b32.xlu1 %v1950_v17, %s1874_s15 }
  0xee   : > { %v392_v25 = vrot.slane %v391_v23, 2  ;;  %v399_v26 = vrot.slane %v398_v24, 4 }
  0xf0   : > { %v393_v27 = vadd.f32 %v392_v25, %v391_v23  ;;  %v400_v28 = vadd.f32 %v399_v26, %v398_v24 }
  0xf2   : > { %v394_v29 = vrot.slane %v393_v27, 1  ;;  %v401_v30 = vrot.slane %v400_v28, 2 }
  0xf4   : > { %v395_v31 = vadd.f32 %v394_v29, %v393_v27  ;;  %v402_v32 = vadd.f32 %v401_v30, %v400_v28 }
  0xf6   : > { %v406_v33 = vmul.f32 0.0625, %v395_v31  ;;  %v403_v34 = vrot.slane %v402_v32, 1 }
  0xf8   : > { %v408_v35 = vsub.f32 %v368_v11, %v406_v33  ;;  %v409_v36 = vsub.f32 %v1745_v9, %v406_v33  ;;  %v404_v37 = vadd.f32 %v403_v34, %v402_v32 }
  0xfa   : > { %v412_v38 = vmul.f32 %v408_v35, %v408_v35  ;;  %v413_v39 = vmul.f32 %v409_v36, %v409_v36  ;;  %v407_v40 = vmul.f32 0.0625, %v404_v37 }
  0xfc   : > { %v416_v41 = vsel %vm289_vm0, %v412_v38, 0.0  ;;  %v417_v42 = vsel %vm289_vm0, %v413_v39, 0.0  ;;  %v410_v43 = vsub.f32 %v378_v21, %v407_v40  ;;  %v411_v44 = vsub.f32 %v1748_v18, %v407_v40 }
  0xfd   : > { %v418_v45 = vadd.f32 %v417_v42, %v416_v41 }
  0xfe   : > { %v414_v46 = vmul.f32 %v410_v43, %v410_v43  ;;  %v415_v47 = vmul.f32 %v411_v44, %v411_v44 }
  0xff   : > { %v419_v48 = vrot.slane %v418_v45, 4 }
 0x100   : > { %v425_v49 = vsel %vm289_vm0, %v414_v46, 0.0  ;;  %v426_v50 = vsel %vm289_vm0, %v415_v47, 0.0 }
 0x101   : > { %v420_v51 = vadd.f32 %v419_v48, %v418_v45  ;;  %v427_v52 = vadd.f32 %v426_v50, %v425_v49 }
 0x103   : > { %v421_v53 = vrot.slane %v420_v51, 2  ;;  %v428_v54 = vrot.slane %v427_v52, 4 }
 0x105   : > { %v422_v55 = vadd.f32 %v421_v53, %v420_v51  ;;  %v429_v56 = vadd.f32 %v428_v54, %v427_v52 }
 0x107   : > { %v423_v57 = vrot.slane %v422_v55, 1  ;;  %v430_v58 = vrot.slane %v429_v56, 2 }
 0x109   : > { %v424_v59 = vadd.f32 %v423_v57, %v422_v55  ;;  %v431_v60 = vadd.f32 %v430_v58, %v429_v56 }
 0x10b   : > { %v434_v61 = vmul.f32 0.0625, %v424_v59  ;;  %v432_v62 = vrot.slane %v431_v60, 1 }
 0x10d   : > { %v436_v63 = vadd.f32 1e-05, %v434_v61  ;;  %v433_v0 = vadd.f32 %v432_v62, %v431_v60 }
 0x10f   : > { %1825 = vrsqrt.f32 %v436_v63  ;;  %v435_v1 = vmul.f32 0.0625, %v433_v0 }
 0x111   : > { %v437_v2 = vadd.f32 1e-05, %v435_v1 }
 0x113   : > { %1827 = vrsqrt.f32 %v437_v2 }
 0x119   : > { %v1826_v3 = vpop.eup %1825 }
 0x11a   : > { %v440_v4 = vmul.f32 0.35355338, %v1826_v3 }
 0x11c   : > { %v442_v5 = vmul.f32 %v440_v4, %v408_v35  ;;  %v443_v6 = vmul.f32 %v440_v4, %v409_v36 }
 0x11d   : > { %v1828_v7 = vpop.eup %1827 }
 0x11e   : > { %v441_v8 = vmul.f32 0.35355338, %v1828_v7  ;;  %921 = vrot.lane.b32.xlu1 %v442_v5, %s1874_s15  ;;  %1756 = vmatprep.mubr.msk.f32.mxu0 %vm535_vm1, %v442_v5 }
 0x11f   : > { %1757 = vmatmul.mubr.msk.f32.vlgmr.msra.gmra.mrb[4].mxu0 %vm535_vm1, %v443_v6 }
 0x120   : > { %v444_v9 = vmul.f32 %v441_v8, %v410_v43  ;;  %v445_v10 = vmul.f32 %v441_v8, %v411_v44  ;;  %1760 = vmatpush3.xpose.msk.msra.mxu0 %vm535_vm1, %v1948_v14 }
 0x122   : > { %1012 = vrot.lane.b32.xlu1 %v1948_v14, %s1874_s15  ;;  %1761 = vmatprep.mubr.msk.f32.mxu0 %vm535_vm1, %v444_v9 }
 0x123   : > { %1762 = vmatmul.mubr.msk.f32.vlgmr.msra.gmra.mrb[6].mxu0 %vm535_vm1, %v445_v10 }
 0x15b   : > { %v833_v11 = vpop.permute.xlu1 %832 }
 0x15c   : > { %1769 = vmatprep.subr.mxu0 %v833_v11 }
 0x15d   : > { %1770 = vmatpush3.msra.mxu0 %v833_v11 }
 0x15f   : > { %v926_v12 = vpop.permute.xlu1 %925 }
 0x190   : > { %v922_v13 = vpop.permute.xlu1 %921 }
 0x194   : > { %v1013_v15 = vpop.permute.xlu1 %1012 }
 0x195   : > { %1779 = vmatprep.subr.msk.mxu0 %vm535_vm1, %v1013_v15 }
 0x1f2   : > { %v1758_v16 = vpop.f32.mrb[4].mxu0 }
 0x1f3   : > { %v611_v18 = vpop.f32.mrb[5].mxu0  ;;  %v707_v19 = vsel %vm289_vm0, %v1758_v16, -inf }
 0x1f4   : > { %708 = vmax.xlane.f32.xlu0 %v707_v19  ;;  %v704_v22 = vsel %vm289_vm0, %v611_v18, -inf  ;;  %v1684_v19 = vld [vmem:[%s2087_s5 + $0x4] sm:$0xf] }
 0x1f6   : > { %v1763_v20 = vpop.f32.mrb[6].mxu0 }
 0x1f7   : > { %v695_v21 = vpop.f32.mrb[7].mxu0  ;;  %v713_v23 = vsel %vm289_vm0, %v1763_v20, -inf }
 0x1f8   : > { %705 = vmax.xlane.f32.xlu0 %v704_v22  ;;  %714 = vmax.xlane.f32.xlu1 %v713_v23  ;;  %v710_v24 = vsel %vm289_vm0, %v695_v21, -inf }
 0x1fc   : > { %711 = vmax.xlane.f32.xlu1 %v710_v24 }
 0x20d   : > { %1010 = vrot.lane.b32.xlu1 %v445_v10, %s1874_s15 }
 0x20e   : > { %748 = vrot.lane.b32.xlu0 %v1950_v17, %s1873_s14 }
 0x212   : > { %923 = vrot.lane.b32.xlu0 %v443_v6, %s1874_s15 }
 0x216   : > { %1008 = vrot.lane.b32.xlu0 %v444_v9, %s1874_s15 }
 0x281   : > { %v709_v25 = vpop.xlane.xlu0 %708 }
 0x282   : > { %v717_v26 = vsub.f32 %v1758_v16, %v709_v25 }
 0x284   : > { %v722_v30 = vmul.f32 1.442695, %v717_v26 }
 0x285   : > { %v706_v27 = vpop.xlane.xlu0 %705  ;;  %v715_v28 = vpop.xlane.xlu1 %714 }
 0x286   : > { %v716_v29 = vsub.f32 %v611_v18, %v706_v27  ;;  %v719_v31 = vsub.f32 %v1763_v20, %v715_v28  ;;  %v920_v20 = vld [vmem:[%s2087_s5] sm:$0xf] }
 0x288   : > { %v720_v32 = vmul.f32 1.442695, %v716_v29  ;;  %v726_v36 = vmul.f32 1.442695, %v719_v31 }
 0x289   : > { %v749_v33 = vpop.permute.xlu0 %748  ;;  %v712_v34 = vpop.xlane.xlu1 %711 }
 0x28a   : > { %1829 = vpow2.f32 %v720_v32  ;;  %v718_v35 = vsub.f32 %v695_v21, %v712_v34  ;;  %1764 = vmatprep.subr.mxu1 %v749_v33 }
 0x28b   : > { %1831 = vpow2.f32 %v722_v30  ;;  %1765 = vmatpush3.msra.mxu1 %v749_v33 }
 0x28c   : > { %v724_v37 = vmul.f32 1.442695, %v718_v35  ;;  %1774 = vmatprep.subr.msk.mxu1 %vm535_vm1, %v926_v12 }
 0x28d   : > { %v924_v39 = vpop.permute.xlu0 %923  ;;  %v1011_v44 = vpop.permute.xlu1 %1010 }
 0x28e   : > { %1833 = vpow2.f32 %v724_v37 }
 0x28f   : > { %1835 = vpow2.f32 %v726_v36 }
 0x291   : > { %v1009_v43 = vpop.permute.xlu0 %1008 }
 0x294   : > { %v1988_v38 = vpop.eup %1829 }
 0x295   : > { %v1990_v40 = vpop.eup %1831  ;;  %1766 = vmatprep.mubr.msk.f32.mxu1 %vm289_vm0, %v1988_v38  ;;  %v728_v16 = vsel %vm289_vm0, %v1988_v38, 0.0 }
 0x296   : > { %1767 = vmatmul.mubr.msk.f32.vlgmr.msra.gmra.mrb[2].mxu1 %vm289_vm0, %v1990_v40 }
 0x297   : > { %1775 = vmatpush3.xpose.msk.msra.mxu1 %vm535_vm1, %v926_v12  ;;  %1776 = vmatprep.mubr.msk.f32.mxu1 %vm535_vm1, %v922_v13  ;;  %v731_v12 = vsel %vm289_vm0, %v1990_v40, 0.0 }
 0x298   : > { %v1998_v41 = vpop.eup %1833 }
 0x299   : > { %v2000_v42 = vpop.eup %1835  ;;  %1771 = vmatprep.mubr.msk.f32.mxu0 %vm289_vm0, %v1998_v41  ;;  %v734_v18 = vsel %vm289_vm0, %v1998_v41, 0.0 }
 0x29a   : > { %1772 = vmatmul.mubr.msk.f32.vlgmr.msra.gmra.mrb[8].mxu0 %vm289_vm0, %v2000_v42  ;;  %1777 = vmatmul.mubr.msk.f32.vlgmr.msra.gmra.mrb[4].mxu1 %vm535_vm1, %v924_v39 }
 0x29b   : > { %1780 = vmatpush3.xpose.msk.msra.mxu0 %vm535_vm1, %v1013_v15  ;;  %1781 = vmatprep.mubr.msk.f32.mxu0 %vm535_vm1, %v1009_v43  ;;  %v737_v15 = vsel %vm289_vm0, %v2000_v42, 0.0 }
 0x29e   : > { %1782 = vmatmul.mubr.msk.f32.vlgmr.msra.gmra.mrb[10].mxu0 %vm535_vm1, %v1011_v44 }
 0x369   : > { %v2010_v45 = vpop.f32.mrb[2].mxu1 }
 0x36a   : > { %v2012_v46 = vpop.f32.mrb[3].mxu1 }
 0x36d   : > { %v2014_v47 = vpop.f32.mrb[8].mxu0  ;;  %v1778_v48 = vpop.f32.mrb[4].mxu1 }
 0x36e   : > { %v2016_v49 = vpop.f32.mrb[9].mxu0  ;;  %v999_v50 = vpop.f32.mrb[5].mxu1  ;;  %v1098_v51 = vsel %vm289_vm0, %v1778_v48, -inf }
 0x36f   : > { %1099 = vmax.xlane.f32.xlu1 %v1098_v51  ;;  %v1095_v52 = vsel %vm289_vm0, %v999_v50, -inf }
 0x370   : > { %1096 = vmax.xlane.f32.xlu0 %v1095_v52 }
 0x371   : > { %v1783_v53 = vpop.f32.mrb[10].mxu0 }
 0x372   : > { %v1086_v54 = vpop.f32.mrb[11].mxu0  ;;  %v1104_v55 = vsel %vm289_vm0, %v1783_v53, -inf }
 0x373   : > { %v1101_v56 = vsel %vm289_vm0, %v1086_v54, -inf }
 0x374   : > { %1105 = vmax.xlane.f32.xlu0 %v1104_v55 }
 0x378   : > { %1102 = vmax.xlane.f32.xlu0 %v1101_v56 }
 0x380   : > { %1223 = vrot.lane.b32.xlu1 %v1948_v14, %s1875_s16 }
 0x38e   : > { %1139 = vrot.lane.b32.xlu0 %v1950_v17, %s1875_s16 }
 0x3fc   : > { %v1100_v57 = vpop.xlane.xlu1 %1099 }
 0x3fd   : > { %v1108_v58 = vsub.f32 %v1778_v48, %v1100_v57  ;;  %v1097_v59 = vpop.xlane.xlu0 %1096 }
 0x3fe   : > { %v1107_v60 = vsub.f32 %v999_v50, %v1097_v59 }
 0x3ff   : > { %v1113_v61 = vmul.f32 1.442695, %v1108_v58 }
 0x400   : > { %v1111_v62 = vmul.f32 1.442695, %v1107_v60  ;;  %v1224_v63 = vpop.permute.xlu1 %1223 }
 0x401   : > { %1837 = vpow2.f32 %v1113_v61  ;;  %v1106_v0 = vpop.xlane.xlu0 %1105  ;;  %1789 = vmatprep.subr.mxu0 %v1224_v63 }
 0x402   : > { %1839 = vpow2.f32 %v1111_v62  ;;  %v1110_v1 = vsub.f32 %v1783_v53, %v1106_v0  ;;  %1790 = vmatpush3.msra.mxu0 %v1224_v63 }
 0x404   : > { %v1117_v2 = vmul.f32 1.442695, %v1110_v1 }
 0x405   : > { %v1103_v3 = vpop.xlane.xlu0 %1102 }
 0x406   : > { %1841 = vpow2.f32 %v1117_v2  ;;  %v1109_v4 = vsub.f32 %v1086_v54, %v1103_v3 }
 0x408   : > { %v1115_v14 = vmul.f32 1.442695, %v1109_v4 }
 0x409   : > { %v1140_v5 = vpop.permute.xlu0 %1139 }
 0x40a   : > { %1843 = vpow2.f32 %v1115_v14  ;;  %1784 = vmatprep.subr.mxu1 %v1140_v5 }
 0x40b   : > { %v1838_v17 = vpop.eup %1837  ;;  %1785 = vmatpush3.msra.mxu1 %v1140_v5 }
 0x40c   : > { %v1840_v6 = vpop.eup %1839  ;;  %v1122_v7 = vsel %vm289_vm0, %v1838_v17, 0.0  ;;  %1794 = vmatprep.subr.msk.mxu1 %vm1325_vm2, %v1684_v19 }
 0x40d   : > { %1786 = vmatprep.mubr.msk.f32.mxu1 %vm289_vm0, %v1840_v6  ;;  %1123 = vadd.xlane.f32.xlu0 %v1122_v7  ;;  %v1119_v8 = vsel %vm289_vm0, %v1840_v6, 0.0 }
 0x40e   : > { %1120 = vadd.xlane.f32.xlu1 %v1119_v8  ;;  %1787 = vmatmul.mubr.msk.f32.vlgmr.msra.gmra.mrb[6].mxu1 %vm289_vm0, %v1838_v17 }
 0x40f   : > { %1795 = vmatpush3.msk.msra.mxu1 %vm1325_vm2, %v1684_v19 }
 0x410   : > { %v1842_v9 = vpop.eup %1841  ;;  %1802 = vmatprep.subr.msk.mxu1 %vm1325_vm2, %v920_v20 }
 0x411   : > { %v1128_v10 = vsel %vm289_vm0, %v1842_v9, 0.0 }
 0x412   : > { %1129 = vadd.xlane.f32.xlu1 %v1128_v10 }
 0x414   : > { %v1844_v11 = vpop.eup %1843 }
 0x415   : > { %1791 = vmatprep.mubr.msk.f32.mxu0 %vm289_vm0, %v1844_v11  ;;  %v1125_v13 = vsel %vm289_vm0, %v1844_v11, 0.0 }
 0x416   : > { %732 = vadd.xlane.f32.xlu1 %v731_v12  ;;  %1126 = vadd.xlane.f32.xlu0 %v1125_v13 }
 0x417   : > { %1792 = vmatmul.mubr.msk.f32.vlgmr.msra.gmra.mrb[12].mxu0 %vm289_vm0, %v1842_v9 }
 0x41a   : > { %738 = vadd.xlane.f32.xlu1 %v737_v15  ;;  %729 = vadd.xlane.f32.xlu0 %v728_v16 }
 0x41e   : > { %735 = vadd.xlane.f32.xlu0 %v734_v18 }
 0x49a   : > { %v1124_v21 = vpop.xlane.xlu0 %1123 }
 0x49b   : > { %v1121_v22 = vpop.xlane.xlu1 %1120 }
 0x49c   : > { %1845 = vrcp.f32 %v1121_v22 }
 0x49d   : > { %1847 = vrcp.f32 %v1124_v21 }
 0x49f   : > { %v1130_v24 = vpop.xlane.xlu1 %1129 }
 0x4a3   : > { %v1127_v23 = vpop.xlane.xlu0 %1126  ;;  %v733_v26 = vpop.xlane.xlu1 %732 }
 0x4a4   : > { %1849 = vrcp.f32 %v1127_v23 }
 0x4a6   : > { %v1846_v28 = vpop.eup %1845 }
 0x4a7   : > { %v730_v25 = vpop.xlane.xlu0 %729  ;;  %v1848_v31 = vpop.eup %1847 }
 0x4a8   : > { %1851 = vrcp.f32 %v730_v25  ;;  %v739_v34 = vpop.xlane.xlu1 %738 }
 0x4a9   : > { %1853 = vrcp.f32 %v1130_v24 }
 0x4aa   : > { %1855 = vrcp.f32 %v733_v26 }
 0x4ab   : > { %v736_v29 = vpop.xlane.xlu0 %735 }
 0x4ac   : > { %1857 = vrcp.f32 %v736_v29 }
 0x4ad   : > { %1859 = vrcp.f32 %v739_v34 }
 0x4ae   : > { %v1850_v35 = vpop.eup %1849 }
 0x4b2   : > { %v1852_v37 = vpop.eup %1851 }
 0x4b3   : > { %v1854_v39 = vpop.eup %1853  ;;  %v916_v43 = vmul.f32 %v1852_v37, %v2012_v46 }
 0x4b4   : > { %v1856_v42 = vpop.eup %1855 }
 0x4b5   : > { %v917_v48 = vmul.f32 %v1856_v42, %v2010_v45 }
 0x4b6   : > { %v1858_v44 = vpop.eup %1857 }
 0x4b7   : > { %v1860_v50 = vpop.eup %1859  ;;  %v918_v51 = vmul.f32 %v1858_v44, %v2016_v49 }
 0x4b8   : > { %v919_v52 = vmul.f32 %v1860_v50, %v2014_v47 }
 0x4e1   : > { %v1788_v27 = vpop.f32.mrb[6].mxu1 }
 0x4e2   : > { %v1214_v30 = vpop.f32.mrb[7].mxu1  ;;  %v1308_v33 = vmul.f32 %v1848_v31, %v1788_v27 }
 0x4e3   : > { %v1307_v32 = vmul.f32 %v1846_v28, %v1214_v30 }
 0x4e5   : > { %1796 = vmatprep.mubr.msk.f32.mxu1 %vm535_vm1, %v1307_v32 }
 0x4e6   : > { %1797 = vmatmul.mubr.msk.f32.vlgmr.msra.gmra.mrb[8].mxu1 %vm535_vm1, %v1308_v33 }
 0x4e7   : > { %1803 = vmatpush3.msk.msra.mxu1 %vm1325_vm2, %v920_v20 }
 0x4ea   : > { %v1793_v36 = vpop.f32.mrb[12].mxu0 }
 0x4eb   : > { %v1298_v38 = vpop.f32.mrb[13].mxu0  ;;  %v1310_v41 = vmul.f32 %v1854_v39, %v1793_v36 }
 0x4ec   : > { %v1309_v40 = vmul.f32 %v1850_v35, %v1298_v38 }
 0x4ee   : > { %1799 = vmatprep.mubr.msk.f32.mxu1 %vm535_vm1, %v1309_v40 }
 0x4ef   : > { %1800 = vmatmul.mubr.msk.f32.gmra.mrb[10].mxu1 %vm535_vm1, %v1310_v41 }
 0x4f0   : > { %1804 = vmatprep.mubr.msk.f32.mxu1 %vm535_vm1, %v916_v43 }
 0x4f3   : > { %1805 = vmatmul.mubr.msk.f32.vlgmr.msra.gmra.mrb[8].mxu1 %vm535_vm1, %v917_v48 }
 0x4f4   : > { %1807 = vmatprep.mubr.msk.f32.mxu1 %vm535_vm1, %v918_v51 }
 0x4f7   : > { %1808 = vmatmul.mubr.msk.f32.gmra.mrb[10].mxu1 %vm535_vm1, %v919_v52 }
 0x5c6   : > { %v1806_v53 = vpop.f32.mrb[8].mxu1 }
 0x5c7   : > { %v1515_v46 = vsel %vm289_vm0, %v1806_v53, 0.0  ;;  %v1495_v54 = vpop.f32.mrb[9].mxu1 }
 0x5c8   : > { %v1514_v55 = vsel %vm289_vm0, %v1495_v54, 0.0 }
 0x5c9   : > { %v1516_v56 = vadd.f32 %v1515_v46, %v1514_v55 }
 0x5ca   : > { %v1809_v57 = vpop.f32.mrb[10].mxu1 }
 0x5cb   : > { %v1517_v45 = vrot.slane %v1516_v56, 4  ;;  %v1524_v58 = vsel %vm289_vm0, %v1809_v57, 0.0  ;;  %v1505_v49 = vpop.f32.mrb[11].mxu1 }
 0x5cc   : > { %v1523_v59 = vsel %vm289_vm0, %v1505_v49, 0.0 }
 0x5cd   : > { %v1518_v60 = vadd.f32 %v1517_v45, %v1516_v56  ;;  %v1525_v61 = vadd.f32 %v1524_v58, %v1523_v59 }
 0x5cf   : > { %v1519_v62 = vrot.slane %v1518_v60, 2  ;;  %v1526_v47 = vrot.slane %v1525_v61, 4 }
 0x5d1   : > { %v1520_v63 = vadd.f32 %v1519_v62, %v1518_v60  ;;  %v1527_v0 = vadd.f32 %v1526_v47, %v1525_v61 }
 0x5d3   : > { %v1521_v1 = vrot.slane %v1520_v63, 1  ;;  %v1528_v2 = vrot.slane %v1527_v0, 2 }
 0x5d5   : > { %v1522_v3 = vadd.f32 %v1521_v1, %v1520_v63  ;;  %v1529_v4 = vadd.f32 %v1528_v2, %v1527_v0 }
 0x5d7   : > { %v1532_v14 = vmul.f32 0.0625, %v1522_v3  ;;  %v1530_v5 = vrot.slane %v1529_v4, 1 }
 0x5d9   : > { %v1534_v17 = vsub.f32 %v1495_v54, %v1532_v14  ;;  %v1535_v6 = vsub.f32 %v1806_v53, %v1532_v14  ;;  %v1531_v7 = vadd.f32 %v1530_v5, %v1529_v4 }
 0x5db   : > { %v1538_v8 = vmul.f32 %v1534_v17, %v1534_v17  ;;  %v1539_v9 = vmul.f32 %v1535_v6, %v1535_v6  ;;  %v1533_v10 = vmul.f32 0.0625, %v1531_v7 }
 0x5dd   : > { %v1542_v11 = vsel %vm289_vm0, %v1538_v8, 0.0  ;;  %v1543_v12 = vsel %vm289_vm0, %v1539_v9, 0.0  ;;  %v1536_v13 = vsub.f32 %v1505_v49, %v1533_v10  ;;  %v1537_v15 = vsub.f32 %v1809_v57, %v1533_v10 }
 0x5de   : > { %v1544_v16 = vadd.f32 %v1543_v12, %v1542_v11 }
 0x5df   : > { %v1540_v18 = vmul.f32 %v1536_v13, %v1536_v13  ;;  %v1541_v19 = vmul.f32 %v1537_v15, %v1537_v15 }
 0x5e0   : > { %v1545_v20 = vrot.slane %v1544_v16, 4 }
 0x5e1   : > { %v1551_v21 = vsel %vm289_vm0, %v1540_v18, 0.0  ;;  %v1552_v22 = vsel %vm289_vm0, %v1541_v19, 0.0 }
 0x5e2   : > { %v1546_v23 = vadd.f32 %v1545_v20, %v1544_v16  ;;  %v1553_v24 = vadd.f32 %v1552_v22, %v1551_v21 }
 0x5e4   : > { %v1547_v25 = vrot.slane %v1546_v23, 2  ;;  %v1554_v26 = vrot.slane %v1553_v24, 4 }
 0x5e6   : > { %v1548_v27 = vadd.f32 %v1547_v25, %v1546_v23  ;;  %v1555_v28 = vadd.f32 %v1554_v26, %v1553_v24 }
 0x5e8   : > { %v1549_v29 = vrot.slane %v1548_v27, 1  ;;  %v1556_v30 = vrot.slane %v1555_v28, 2 }
 0x5ea   : > { %v1550_v31 = vadd.f32 %v1549_v29, %v1548_v27  ;;  %v1557_v32 = vadd.f32 %v1556_v30, %v1555_v28 }
 0x5ec   : > { %v1560_v33 = vmul.f32 0.0625, %v1550_v31  ;;  %v1558_v34 = vrot.slane %v1557_v32, 1 }
 0x5ee   : > { %v1562_v35 = vadd.f32 1e-05, %v1560_v33  ;;  %v1559_v36 = vadd.f32 %v1558_v34, %v1557_v32 }
 0x5f0   : > { %1861 = vrsqrt.f32 %v1562_v35  ;;  %v1561_v37 = vmul.f32 0.0625, %v1559_v36 }
 0x5f2   : > { %v1563_v38 = vadd.f32 1e-05, %v1561_v37 }
 0x5f4   : > { %1863 = vrsqrt.f32 %v1563_v38 }
 0x5fa   : > { %v1862_v39 = vpop.eup %1861 }
 0x5fb   : > { %v1566_v40 = vmul.f32 %v1862_v39, %v1534_v17  ;;  %v1567_v41 = vmul.f32 %v1862_v39, %v1535_v6 }
 0x5fd   : > { %1570 = vst.msk [vmem:[%s280_s24] sm:$0xff] %vm289_vm0, %v1566_v40  ;;  %1571 = vst.msk [vmem:[%s280_s24 + $0x8] sm:$0xff] %vm289_vm0, %v1567_v41 }
 0x5fe   : > { %v1864_v42 = vpop.eup %1863 }
 0x5ff   : > { %v1568_v43 = vmul.f32 %v1864_v42, %v1536_v13  ;;  %v1569_v44 = vmul.f32 %v1864_v42, %v1537_v15 }
 0x601   : > { %1572 = vst.msk [vmem:[%s280_s24 + $0x10] sm:$0xff] %vm289_vm0, %v1568_v43  ;;  %1573 = vst.msk [vmem:[%s280_s24 + $0x18] sm:$0xff] %vm289_vm0, %v1569_v44 }
 0x602 PF: > { %s16_s21 = sadd.s32 1, %s1871_s21  }
 0x603   : > { %p13_p4 = scmp.ge.s32.totalorder %s16_s21, 4  }
 0x605   :  { %15 = sbr.rel (!%p13_p4) target bundleno = 1 (0x1), region = 78 }

</bundles_post_ra>
